<compile_context>
chip_gen: v7x
topology: tpu7x:2x2x1
jax: 0.10.0
libtpu: 0.0.40
codegen_flags: <defaults>
</compile_context>

<pallas_src>
import functools

import jax
import jax.numpy as jnp
from jax.experimental import pallas as pl
from jax.experimental.pallas import tpu as pltpu

IN_FEATURES = 784      # 28 * 28 (nn.Flatten of [B, 1, 28, 28])
HIDDEN = 128
OUT_FEATURES = 100
OUT_PAD = 128          # lane-dense output; padding sliced off in the wrapper


def _round_up(x, m):
    return (x + m - 1) // m * m


def _mlp_kernel(x_ref, w1_ref, b1_ref, w2_ref, b2_ref, o_ref):
    # x arrives as f32 straight from HBM; cast to bf16 in-kernel (VPU has large
    # slack here, and this avoids a separate pad/cast pass over x in HBM).
    x = x_ref[...].astype(jnp.bfloat16)                        # [tb, 784]
    # Layer 1: Linear(784 -> 128) + ReLU.  bf16 matmul, f32 accumulate.
    h = jnp.dot(x, w1_ref[...], preferred_element_type=jnp.float32)
    h = jnp.maximum(h + b1_ref[...], 0.0)                      # b1: [1, 128] f32
    # Layer 2: Linear(128 -> 128-padded) + ReLU, stored bf16 (lane-dense).
    o = jnp.dot(h.astype(jnp.bfloat16), w2_ref[...],
                preferred_element_type=jnp.float32)
    o_ref[...] = jnp.maximum(o + b2_ref[...], 0.0).astype(o_ref.dtype)


def prepare_params(w1, b1, w2, b2):
    """One-time parameter prep (keep the results; do NOT redo this per call).

    w1: [784, 128], b1: [1, 128] (or [128]), w2: [128, 100], b2: [1, 100]
    (weights stored transposed vs. PyTorch's [out, in] layout).
    Returns bf16 weights and f32 biases with the output dim padded 100 -> 128.
    """
    w1_p = jnp.asarray(w1, jnp.float32).astype(jnp.bfloat16)              # [784, 128]
    b1_p = jnp.asarray(b1, jnp.float32).reshape(1, HIDDEN)                # [1, 128]
    w2_p = jnp.pad(jnp.asarray(w2, jnp.float32),
                   ((0, 0), (0, OUT_PAD - OUT_FEATURES))).astype(jnp.bfloat16)
    b2_p = jnp.pad(jnp.asarray(b2, jnp.float32).reshape(1, OUT_FEATURES),
                   ((0, 0), (0, OUT_PAD - OUT_FEATURES)))                 # [1, 128]
    return w1_p, b1_p, w2_p, b2_p


@functools.partial(jax.jit, static_argnames=("tb",))
def client_model_forward(x, w1_p, b1_p, w2_p, b2_p, *, tb=2048):
    """x: [B, 1, 28, 28] float32 -> [B, 100] float32.

    Params come from prepare_params().  tb is the batch tile: 2048 is a good
    default on v6e/v7x; it is also safe on v5e because vmem_limit_bytes is
    raised explicitly below.
    """
    B = x.shape[0]
    x_flat = x.reshape(B, -1)            # nn.Flatten(): [B, 784] (layout glue)
    assert x_flat.shape[1] == IN_FEATURES

    # Batch tile: big enough to amortize the ~0.35us per-grid-step overhead,
    # capped at ceil(B/2) (rounded to 16 -- bf16 output sublane packing) so the
    # grid has >= 2 steps and megacore can split the batch.  Tiny batches use a
    # full-array-dim block (bypasses the (8,128) block constraint, no padding).
    if B <= 16:
        tb_eff = B
    else:
        tb_eff = max(16, min(tb, _round_up((B + 1) // 2, 16)))
    grid = (pl.cdiv(B, tb_eff),)

    out = pl.pallas_call(
        _mlp_kernel,
        out_shape=jax.ShapeDtypeStruct((B, OUT_PAD), jnp.bfloat16),
        grid_spec=pltpu.PrefetchScalarGridSpec(
            num_scalar_prefetch=0,
            grid=grid,
            in_specs=[
                # Activations: f32, batch-tiled, pipelined over the grid.
                pl.BlockSpec((tb_eff, IN_FEATURES), lambda i: (i, 0)),
                # Weights / biases: VMEM-resident across all grid steps.
                pl.BlockSpec((IN_FEATURES, HIDDEN), lambda i: (0, 0)),
                pl.BlockSpec((1, HIDDEN), lambda i: (0, 0)),
                pl.BlockSpec((HIDDEN, OUT_PAD), lambda i: (0, 0)),
                pl.BlockSpec((1, OUT_PAD), lambda i: (0, 0)),
            ],
            out_specs=pl.BlockSpec((tb_eff, OUT_PAD), lambda i: (i, 0)),
        ),
        compiler_params=pltpu.CompilerParams(
            # Batch axis is embarrassingly parallel -> megacore sharding.
            dimension_semantics=("parallel",),
            # f32 x blocks at tb=2048 are ~12.8 MiB double-buffered, above
            # v5e's 16 MiB default scoped limit.  48 MiB is safe everywhere:
            # v5e/v6e have 128 MiB physical VMEM, v7x has 64 MiB per TC.
            vmem_limit_bytes=48 * 1024 * 1024,
        ),
    )(x_flat, w1_p, b1_p, w2_p, b2_p)

    # Drop the lane padding and return f32 (matches the PyTorch module's
    # output dtype).  The slice + convert fuse into one small XLA op.
    return out[:, :OUT_FEATURES].astype(jnp.float32)


def init_linear_params(key, fan_in, fan_out):
    """Mimics torch.nn.Linear.reset_parameters():
    weight, bias ~ U(-1/sqrt(fan_in), 1/sqrt(fan_in)).
    Weight stored as [fan_in, fan_out] (transposed vs. PyTorch's [out, in])."""
    kw, kb = jax.random.split(key)
    bound = 1.0 / jnp.sqrt(jnp.float32(fan_in))
    w = jax.random.uniform(kw, (fan_in, fan_out), jnp.float32, -bound, bound)
    b = jax.random.uniform(kb, (1, fan_out), jnp.float32, -bound, bound)
    return w, b


def _ref_forward(x, w1, b1, w2, b2):
    """Plain-JAX reference matching the kernel's bf16-input / f32-accumulate /
    bf16-output numerics."""
    xb = x.reshape(x.shape[0], -1).astype(jnp.bfloat16).astype(jnp.float32)
    w1b = w1.astype(jnp.bfloat16).astype(jnp.float32)
    w2b = w2.astype(jnp.bfloat16).astype(jnp.float32)
    hp = jax.lax.Precision.HIGHEST
    h = jnp.maximum(jnp.dot(xb, w1b, precision=hp) + b1, 0.0)
    hb = h.astype(jnp.bfloat16).astype(jnp.float32)
    o = jnp.maximum(jnp.dot(hb, w2b, precision=hp) + b2, 0.0)
    return o.astype(jnp.bfloat16).astype(jnp.float32)


if __name__ == "__main__":
    key = jax.random.PRNGKey(0)
    k_x, k_l1, k_l2 = jax.random.split(key, 3)

    # Small MNIST-like batch consistent with Linear(784, ...).
    B = 2
    x = jax.random.normal(k_x, (B, 1, 28, 28), jnp.float32)

    w1, b1 = init_linear_params(k_l1, IN_FEATURES, HIDDEN)
    w2, b2 = init_linear_params(k_l2, HIDDEN, OUT_FEATURES)

    # Pad/cast the weights once, outside the hot path.
    params = prepare_params(w1, b1, w2, b2)

    y = client_model_forward(x, *params)
    y = jax.block_until_ready(y)

    ref = _ref_forward(x, w1, b1, w2, b2)
    assert y.shape == (B, OUT_FEATURES)
    assert y.dtype == jnp.float32
    assert jnp.allclose(y, ref, atol=2e-2, rtol=2e-2), (
        float(jnp.max(jnp.abs(y - ref))))

    print("KERNEL_OK")
</pallas_src>

<mosaic_0001>
module attributes {stable_mosaic.version = 11 : i64} {
  func.func @_mlp_kernel(%arg0: i32, %arg1: memref<2x784xf32, #tpu.memory_space<vmem>>, %arg2: memref<784x128xbf16, #tpu.memory_space<vmem>>, %arg3: memref<1x128xf32, #tpu.memory_space<vmem>>, %arg4: memref<128x128xbf16, #tpu.memory_space<vmem>>, %arg5: memref<1x128xf32, #tpu.memory_space<vmem>>, %arg6: memref<2x128xbf16, #tpu.memory_space<vmem>>) attributes {dimension_semantics = [#tpu.dimension_semantics<parallel>], iteration_bounds = array<i64: 1>, scalar_prefetch = 0 : i64, scratch_operands = 0 : i64, tpu.core_type = #tpu.core_type<tc>, window_params = [{transform_indices = @transform_0, window_bounds = array<i64: 2, 784>}, {pipeline_mode = #tpu.pipeline_mode<synchronous>, transform_indices = @transform_1, window_bounds = array<i64: 784, 128>}, {pipeline_mode = #tpu.pipeline_mode<synchronous>, transform_indices = @transform_2, window_bounds = array<i64: 1, 128>}, {pipeline_mode = #tpu.pipeline_mode<synchronous>, transform_indices = @transform_3, window_bounds = array<i64: 128, 128>}, {pipeline_mode = #tpu.pipeline_mode<synchronous>, transform_indices = @transform_4, window_bounds = array<i64: 1, 128>}, {transform_indices = @transform_5, window_bounds = array<i64: 2, 128>}]} {
    %c0 = arith.constant 0 : index
    %c0_0 = arith.constant 0 : index
    %0 = vector.load %arg1[%c0, %c0_0] : memref<2x784xf32, #tpu.memory_space<vmem>>, vector<2x784xf32>
    %1 = arith.truncf %0 : vector<2x784xf32> to vector<2x784xbf16>
    %c0_1 = arith.constant 0 : index
    %c0_2 = arith.constant 0 : index
    %2 = vector.load %arg2[%c0_1, %c0_2] : memref<784x128xbf16, #tpu.memory_space<vmem>>, vector<784x128xbf16>
    %cst = arith.constant dense<0.000000e+00> : vector<2x128xf32>
    %3 = tpu.matmul %1, %2, %cst {dimension_numbers = #tpu.dot_dimension_numbers<[1], [0], [0], [1], [0, 0, 1, 1], [], []>} : vector<2x784xbf16>, vector<784x128xbf16>, vector<2x128xf32> -> vector<2x128xf32>
    %c0_3 = arith.constant 0 : index
    %c0_4 = arith.constant 0 : index
    %4 = vector.load %arg3[%c0_3, %c0_4] : memref<1x128xf32, #tpu.memory_space<vmem>>, vector<1x128xf32>
    %5 = vector.broadcast %4 : vector<1x128xf32> to vector<2x128xf32>
    %6 = arith.addf %3, %5 : vector<2x128xf32>
    %cst_5 = arith.constant 0.000000e+00 : f32
    %7 = vector.broadcast %cst_5 : f32 to vector<2x128xf32>
    %8 = arith.maximumf %6, %7 : vector<2x128xf32>
    %9 = arith.truncf %8 : vector<2x128xf32> to vector<2x128xbf16>
    %c0_6 = arith.constant 0 : index
    %c0_7 = arith.constant 0 : index
    %10 = vector.load %arg4[%c0_6, %c0_7] : memref<128x128xbf16, #tpu.memory_space<vmem>>, vector<128x128xbf16>
    %cst_8 = arith.constant dense<0.000000e+00> : vector<2x128xf32>
    %11 = tpu.matmul %9, %10, %cst_8 {dimension_numbers = #tpu.dot_dimension_numbers<[1], [0], [0], [1], [0, 0, 1, 1], [], []>} : vector<2x128xbf16>, vector<128x128xbf16>, vector<2x128xf32> -> vector<2x128xf32>
    %c0_9 = arith.constant 0 : index
    %c0_10 = arith.constant 0 : index
    %12 = vector.load %arg5[%c0_9, %c0_10] : memref<1x128xf32, #tpu.memory_space<vmem>>, vector<1x128xf32>
    %13 = vector.broadcast %12 : vector<1x128xf32> to vector<2x128xf32>
    %14 = arith.addf %11, %13 : vector<2x128xf32>
    %cst_11 = arith.constant 0.000000e+00 : f32
    %15 = vector.broadcast %cst_11 : f32 to vector<2x128xf32>
    %16 = arith.maximumf %14, %15 : vector<2x128xf32>
    %17 = arith.truncf %16 : vector<2x128xf32> to vector<2x128xbf16>
    %c0_12 = arith.constant 0 : index
    %c0_13 = arith.constant 0 : index
    %18 = vector.load %arg6[%c0_12, %c0_13] : memref<2x128xbf16, #tpu.memory_space<vmem>>, vector<2x128xbf16>
    tpu.vector_store %arg6[%c0_12, %c0_13], %17 {strides = array<i32>} : memref<2x128xbf16, #tpu.memory_space<vmem>>, vector<2x128xbf16>,
    return
  }
  func.func @transform_0(%arg0: i32) -> (i32, i32) {
    %c0_i32 = arith.constant 0 : i32
    %c0_i32_0 = arith.constant 0 : i32
    return %arg0, %c0_i32 : i32, i32
  }
  func.func @transform_1(%arg0: i32) -> (i32, i32) {
    %c0_i32 = arith.constant 0 : i32
    %c0_i32_0 = arith.constant 0 : i32
    %c0_i32_1 = arith.constant 0 : i32
    return %c0_i32, %c0_i32_0 : i32, i32
  }
  func.func @transform_2(%arg0: i32) -> (i32, i32) {
    %c0_i32 = arith.constant 0 : i32
    %c0_i32_0 = arith.constant 0 : i32
    %c0_i32_1 = arith.constant 0 : i32
    return %c0_i32, %c0_i32_0 : i32, i32
  }
  func.func @transform_3(%arg0: i32) -> (i32, i32) {
    %c0_i32 = arith.constant 0 : i32
    %c0_i32_0 = arith.constant 0 : i32
    %c0_i32_1 = arith.constant 0 : i32
    return %c0_i32, %c0_i32_0 : i32, i32
  }
  func.func @transform_4(%arg0: i32) -> (i32, i32) {
    %c0_i32 = arith.constant 0 : i32
    %c0_i32_0 = arith.constant 0 : i32
    %c0_i32_1 = arith.constant 0 : i32
    return %c0_i32, %c0_i32_0 : i32, i32
  }
  func.func @transform_5(%arg0: i32) -> (i32, i32) {
    %c0_i32 = arith.constant 0 : i32
    %c0_i32_0 = arith.constant 0 : i32
    return %arg0, %c0_i32 : i32, i32
  }
}

</mosaic_0001>

<bundles_post_ra>
// kernel: client_model_forward.1
= control target key start
LH: loop header
LB: loop body
LE: loop exit
PB: predicated region body
PF: predicated region fallthrough
CT: control target
= control target key end

     0   :  { %10 = vsyncpa [#allocation3], 0  ;;  %s1022_s18 = smov [#allocation2]   ;;  %s1123_s0 = inlined_call_operand.vmem [shape: f32[2,784], index: 0, kind: input, shape index: {}]   ;;  %s1124_s1 = inlined_call_operand.hbm [shape: bf16[784,128], index: 1, kind: input, shape index: {}]   ;;  %s1125_s2 = inlined_call_operand.vmem [shape: f32[1,128], index: 2, kind: input, shape index: {}]   ;;  %s1126_s3 = inlined_call_operand.vmem [shape: bf16[128,128], index: 3, kind: input, shape index: {}]   ;;  %s1127_s4 = inlined_call_operand.vmem [shape: f32[1,128], index: 4, kind: input, shape index: {}]   ;;  %s1128_s5 = inlined_call_operand.vmem [shape: bf16[2,128], index: 5, kind: output, shape index: {}]  }
   0x1   :  { %s18_s19 = sshll.u32 %s1022_s18, 4  ;;  %s998_s22 = scalar_lea.hbm %s1124_s1, 6272  ;;  %s19_s19 = int_to_ptr.vmem [resolvable:$true] %s18_s19 }
   0x2   :  { %p999_p0 = scmp.ne.s32.totalorder %s1124_s1, %s998_s22  ;;  %p1002_p1 = scmp.lt.u32.totalorder %s998_s22, %s1124_s1 }
   0x4   :  { %p1004_p2 = pnand %p1002_p1, %p999_p0 }
   0x6   :  { %1007 = shalt.err (!%p1004_p2)
}
   0x7   :  { %s1008_s27 = scalar_lea.vmem %s19_s19, 6272  ;;  %p1013_p4 = scmp.lt.s32.totalorder %s19_s19, %s19_s19 }
   0x8   :  { %p1009_p3 = scmp.ne.s32.totalorder %s19_s19, %s1008_s27  ;;  %p1014_p5 = scmp.lt.s32.totalorder %s1008_s27, %s1008_s27 }
   0xa   :  { %p1015_p6 = por %p1014_p5, %p1013_p4 }
   0xc   :  { %p1016_p7 = pnand %p1015_p6, %p1009_p3 }
   0xe   :  { %1019 = shalt.err (!%p1016_p7)
}
   0xf   :  { %s1023_s28 = smov 64   ;;  %s1024_s29 = smov 4  }
  0x10   :  { %24 = dma.hbm_to_vmem [thread:$0]  %s1124_s1, 6272, %s19_s19, [#allocation3], %s1023_s28, %s1023_s28, %s1024_s29  }
  0x11   :  { %1020 = dma.done.wait [#allocation3], 6272  }
  0x12   :  { %1021 = vsyncadd [#allocation3], 4294961024  ;;  %v939_v0 = vld [vmem:[#allocation2 + $0x40] sm:$0xff]   ;;  %v943_v4 = vld [vmem:[#allocation2 + $0x48] sm:$0xff]   ;;  %v1025_v21 = vmov 1983009808   ;;  %v43_v23 = vlaneseq }
  0x13   :  { %v940_v1 = vld [vmem:[#allocation2] sm:$0xff]   ;;  %830 = vmatprep.subr.bf16.mxu0 %v939_v0  ;;  %v944_v5 = vld [vmem:[#allocation2 + $0x8] sm:$0xff]   ;;  %v947_v8 = vld [vmem:[#allocation2 + $0x50] sm:$0xff]   ;;  %v41_v22 = vunpack.c.l.s4 %v1025_v21  ;;  %v1026_v45 = vmov 0.0   ;;  %vm1027_vm0 = vmmov 0   ;;  %vm485_vm1 = vcmask 130048  }
  0x14   :  { %v941_v2 = vld [vmem:[#allocation2 + $0xc0] sm:$0xff]   ;;  %831 = vmatpush3.bf16.msra.mxu0 %v940_v1  ;;  %v945_v6 = vld [vmem:[#allocation2 + $0xc8] sm:$0xff]   ;;  %v948_v9 = vld [vmem:[#allocation2 + $0x10] sm:$0xff]   ;;  %v44_v29 = vshrl.u32 %v43_v23, 7 }
  0x15   :  { %v942_v3 = vld [vmem:[#allocation2 + $0x80] sm:$0xff]   ;;  %852 = vmatprep.subr.bf16.mxu1 %v941_v2  ;;  %832 = vmatprep.subr.bf16.mxu0 %v943_v4  ;;  %v946_v7 = vld [vmem:[#allocation2 + $0x88] sm:$0xff]   ;;  %v949_v10 = vld [vmem:[#allocation2 + $0xd0] sm:$0xff]   ;;  %v42_v28 = vunpack.c.0.s8 %v41_v22 }
  0x16   :  { %853 = vmatpush3.bf16.msra.mxu1 %v942_v3  ;;  %v950_v11 = vld [vmem:[#allocation2 + $0x90] sm:$0xff]   ;;  %v951_v12 = vld [vmem:[#allocation2 + $0x58] sm:$0xff]   ;;  %v955_v16 = vld [vmem:[#allocation2 + $0x60] sm:$0xff]  }
  0x17   :  { %854 = vmatprep.subr.bf16.mxu1 %v945_v6  ;;  %v952_v13 = vld [vmem:[#allocation2 + $0x18] sm:$0xff]   ;;  %v956_v17 = vld [vmem:[#allocation2 + $0x20] sm:$0xff]   ;;  %v959_v20 = vld [vmem:[#allocation2 + $0x68] sm:$0xff]   ;;  %v45_v34 = vsub.s32 %v42_v28, %v44_v29 }
  0x18   :  { %833 = vmatpush3.bf16.msra.mxu0 %v944_v5  ;;  %v953_v14 = vld [vmem:[#allocation2 + $0xd8] sm:$0xff]   ;;  %v957_v18 = vld [vmem:[#allocation2 + $0xe0] sm:$0xff]   ;;  %v960_v24 = vld [vmem:[#allocation2 + $0x28] sm:$0xff]  }
  0x19   :  { %834 = vmatprep.subr.bf16.mxu0 %v947_v8  ;;  %v954_v15 = vld [vmem:[#allocation2 + $0x98] sm:$0xff]   ;;  %v958_v19 = vld [vmem:[#allocation2 + $0xa0] sm:$0xff]   ;;  %v961_v25 = vld [vmem:[#allocation2 + $0xe8] sm:$0xff]  }
  0x1a   :  { %855 = vmatpush3.bf16.msra.mxu1 %v946_v7  ;;  %v962_v26 = vld [vmem:[#allocation2 + $0xa8] sm:$0xff]   ;;  %v963_v27 = vld [vmem:[#allocation2 + $0x70] sm:$0xff]   ;;  %v967_v33 = vld [vmem:[#allocation2 + $0x78] sm:$0xff]  }
  0x1b   :  { %856 = vmatprep.subr.bf16.mxu1 %v949_v10  ;;  %v964_v30 = vld [vmem:[#allocation2 + $0x30] sm:$0xff]   ;;  %v968_v35 = vld [vmem:[#allocation2 + $0x38] sm:$0xff]   ;;  %v35_v37 = vld [vmem:[%s1123_s0] sm:$0xff] }
  0x1c   :  { %835 = vmatpush3.bf16.msra.mxu0 %v948_v9  ;;  %v965_v31 = vld [vmem:[#allocation2 + $0xf0] sm:$0xff]   ;;  %v969_v36 = vld [vmem:[#allocation2 + $0xf8] sm:$0xff]   ;;  %v46_v38 = vrot.slane %v35_v37, %v45_v34  ;;  %v39_v40 = vcombine.high %v35_v37, %v35_v37  ;;  %v971_v41 = vld [vmem:[#allocation2 + $0x140] sm:$0xff]  }
  0x1d   :  { %836 = vmatprep.subr.bf16.mxu0 %v951_v12  ;;  %v966_v32 = vld [vmem:[#allocation2 + $0xb0] sm:$0xff]   ;;  %v970_v39 = vld [vmem:[#allocation2 + $0xb8] sm:$0xff]   ;;  %v973_v48 = vld [vmem:[#allocation2 + $0x100] sm:$0xff]  }
  0x1e   :  { %857 = vmatpush3.bf16.msra.mxu1 %v950_v11  ;;  %v54_v42 = vcombine.high %v46_v38, %v46_v38  ;;  %v53_v43 = vrot.slane %v39_v40, %v45_v34  ;;  %v79_v44 = vpack.c.bf16 %v46_v38, %v46_v38  ;;  %v974_v50 = vld [vmem:[#allocation2 + $0x148] sm:$0xff]   ;;  %v976_v53 = vld [vmem:[#allocation2 + $0x150] sm:$0xff]   ;;  %v978_v55 = vld [vmem:[#allocation2 + $0x158] sm:$0xff]  }
  0x1f   :  { %858 = vmatprep.subr.bf16.mxu1 %v953_v14  ;;  %v975_v52 = vld [vmem:[#allocation2 + $0x108] sm:$0xff]   ;;  %v977_v54 = vld [vmem:[#allocation2 + $0x110] sm:$0xff]   ;;  %v979_v56 = vld [vmem:[#allocation2 + $0x118] sm:$0xff]  }
  0x20   :  { %837 = vmatpush3.bf16.msra.mxu0 %v952_v13  ;;  %v80_v46 = vpack.c.bf16 %v54_v42, %v54_v42  ;;  %v55_v47 = vcombine.high %v53_v43, %v53_v43  ;;  %v81_v49 = vpack.c.bf16 %v53_v43, %v53_v43  ;;  %v980_v57 = vld [vmem:[#allocation2 + $0x160] sm:$0xff]   ;;  %v36_v59 = vld [vmem:[%s1123_s0 + $0x8] sm:$0x3f]  ;;  %v984_v5 = vld [vmem:[#allocation2 + $0x170] sm:$0xff]  }
  0x21   :  { %838 = vmatprep.subr.bf16.mxu0 %v955_v16  ;;  %v988_v58 = vld [vmem:[#allocation2 + $0x180] sm:$0xff]   ;;  %v56_v61 = vcombine.high %v36_v59, %v36_v59  ;;  %v63_v62 = vrot.slane %v36_v59, %v45_v34  ;;  %v982_v63 = vld [vmem:[#allocation2 + $0x168] sm:$0xff]   ;;  %v985_v6 = vld [vmem:[#allocation2 + $0x130] sm:$0xff]  }
  0x22   :  { %859 = vmatpush3.bf16.msra.mxu1 %v954_v15  ;;  %521 = vmatprep.mubr.bf16.mxu0 %v80_v46  ;;  %v82_v51 = vpack.c.bf16 %v55_v47, %v55_v47  ;;  %v981_v60 = vld [vmem:[#allocation2 + $0x120] sm:$0xff]   ;;  %v983_v4 = vld [vmem:[#allocation2 + $0x128] sm:$0xff]   ;;  %v986_v7 = vld [vmem:[#allocation2 + $0x178] sm:$0xff]  }
  0x23   :  { %860 = vmatprep.subr.bf16.mxu1 %v957_v18  ;;  %v70_v0 = vrot.slane %v56_v61, %v45_v34  ;;  %v71_v1 = vcombine.high %v63_v62, %v63_v62  ;;  %v987_v8 = vld [vmem:[#allocation2 + $0x138] sm:$0xff]   ;;  %v83_v9 = vpack.c.bf16 %v63_v62, %v63_v62  ;;  %v990_v10 = vld [vmem:[%s1126_s3] sm:$0xff]   ;;  %v991_v11 = vld [vmem:[%s1126_s3 + $0x8] sm:$0xff]  }
  0x24   :  { %839 = vmatpush3.bf16.msra.mxu0 %v956_v17  ;;  %561 = vmatprep.mubr.bf16.mxu1 %v82_v51  ;;  %v992_v12 = vld [vmem:[%s1126_s3 + $0x10] sm:$0xff]   ;;  %v993_v13 = vld [vmem:[%s1126_s3 + $0x18] sm:$0xff]   ;;  %v994_v14 = vld [vmem:[%s1126_s3 + $0x20] sm:$0xff]  }
  0x25   :  { %840 = vmatprep.subr.bf16.mxu0 %v959_v20  ;;  %v84_v2 = vpack.c.bf16 %v71_v1, %v71_v1  ;;  %v85_v3 = vpack.c.bf16 %v70_v0, %v70_v0  ;;  %v995_v15 = vld [vmem:[%s1126_s3 + $0x28] sm:$0xff]   ;;  %v996_v16 = vld [vmem:[%s1126_s3 + $0x30] sm:$0xff]   ;;  %v997_v17 = vld [vmem:[%s1126_s3 + $0x38] sm:$0xff]  }
  0x26   :  { %861 = vmatpush3.bf16.msra.mxu1 %v958_v19  ;;  %v770_v19 = vld [vmem:[%s1125_s2] ss:$0 sm:$0xff] }
  0x27   :  { %862 = vmatprep.subr.bf16.mxu1 %v961_v25 }
  0x28   :  { %841 = vmatpush3.bf16.msra.mxu0 %v960_v24 }
  0x29   :  { %842 = vmatprep.subr.bf16.mxu0 %v963_v27 }
  0x2a   :  { %863 = vmatpush3.bf16.msra.mxu1 %v962_v26 }
  0x2b   :  { %864 = vmatprep.subr.bf16.mxu1 %v965_v31 }
  0x2c   :  { %843 = vmatpush3.bf16.msra.mxu0 %v964_v30 }
  0x2d   :  { %844 = vmatprep.subr.bf16.mxu0 %v967_v33 }
  0x2e   :  { %865 = vmatpush3.bf16.msra.mxu1 %v966_v32 }
  0x2f   :  { %866 = vmatprep.subr.bf16.mxu1 %v969_v36 }
  0x30   :  { %845 = vmatpush3.bf16.msra.mxu0 %v968_v35 }
  0x31   :  { %874 = vmatprep.subr.bf16.mxu0 %v971_v41 }
  0x32   :  { %867 = vmatpush3.bf16.msra.mxu1 %v970_v39 }
  0x33   :  { %907 = vmatprep.subr.bf16.mxu1 %v1026_v45  ;;  %522 = vmatmul.mubr.bf16.vlgmr.msra.gmra.mrb[0].mxu0 %v79_v44  ;;  %v821_v44 = vld [vmem:[%s1127_s4] ss:$0 sm:$0xff] }
  0x34   :  { %875 = vmatpush3.bf16.msra.mxu0 %v973_v48  ;;  %601 = vmatprep.mubr.bf16.mxu0 %v84_v2 }
  0x35   :  { %562 = vmatmul.mubr.bf16.vlgmr.msra.gmra.mrb[0].mxu1 %v81_v49  ;;  %876 = vmatprep.subr.bf16.mxu0 %v974_v50 }
  0x36   :  { %909 = vmatprep.mubr.msk.bf16.mxu1 %vm1027_vm0, %v1026_v45  ;;  %908 = vmatpush3.bf16.msra.mxu1 %v988_v58 }
  0x37   :  { %913 = vmatprep.subr.bf16.mxu1 %v1026_v45 }
  0x38   :  { %877 = vmatpush3.bf16.msra.mxu0 %v975_v52 }
  0x39   :  { %878 = vmatprep.subr.bf16.mxu0 %v976_v53 }
  0x3c   :  { %879 = vmatpush3.bf16.msra.mxu0 %v977_v54 }
  0x3d   :  { %880 = vmatprep.subr.bf16.mxu0 %v978_v55  ;;  %910 = vmatmul.mubr.msk.bf16.vlgmr.msra.gmra.mrb[4].mxu1 %vm485_vm1, %v85_v3 }
  0x3e   :  { %929 = vmatprep.mubr.msk.bf16.mxu1 %vm1027_vm0, %v1026_v45  ;;  %914 = vmatpush3.bf16.msra.mxu1 %v990_v10 }
  0x3f   :  { %915 = vmatprep.subr.bf16.mxu1 %v1026_v45 }
  0x40   :  { %881 = vmatpush3.bf16.msra.mxu0 %v979_v56 }
  0x41   :  { %882 = vmatprep.subr.bf16.mxu0 %v980_v57 }
  0x42   :  { %916 = vmatpush3.bf16.msra.mxu1 %v991_v11 }
  0x43   :  { %917 = vmatprep.subr.bf16.mxu1 %v1026_v45 }
  0x44   :  { %883 = vmatpush3.bf16.msra.mxu0 %v981_v60 }
  0x45   :  { %884 = vmatprep.subr.bf16.mxu0 %v982_v63 }
  0x46   :  { %918 = vmatpush3.bf16.msra.mxu1 %v992_v12 }
  0x47   :  { %919 = vmatprep.subr.bf16.mxu1 %v1026_v45 }
  0x48   :  { %885 = vmatpush3.bf16.msra.mxu0 %v983_v4 }
  0x49   :  { %886 = vmatprep.subr.bf16.mxu0 %v984_v5 }
  0x4a   :  { %920 = vmatpush3.bf16.msra.mxu1 %v993_v13 }
  0x4b   :  { %921 = vmatprep.subr.bf16.mxu1 %v1026_v45 }
  0x4c   :  { %887 = vmatpush3.bf16.msra.mxu0 %v985_v6 }
  0x4d   :  { %888 = vmatprep.subr.bf16.mxu0 %v986_v7 }
  0x4e   :  { %922 = vmatpush3.bf16.msra.mxu1 %v994_v14 }
  0x4f   :  { %923 = vmatprep.subr.bf16.mxu1 %v1026_v45 }
  0x50   :  { %889 = vmatpush3.bf16.msra.mxu0 %v987_v8 }
  0x52   :  { %924 = vmatpush3.bf16.msra.mxu1 %v995_v15 }
  0x53   :  { %602 = vmatmul.mubr.bf16.vlgmr.msra.gmra.mrb[4].mxu0 %v83_v9  ;;  %925 = vmatprep.subr.bf16.mxu1 %v1026_v45 }
  0x56   :  { %926 = vmatpush3.bf16.msra.mxu1 %v996_v16 }
  0x57   :  { %927 = vmatprep.subr.bf16.mxu1 %v1026_v45 }
  0x5a   :  { %928 = vmatpush3.bf16.msra.mxu1 %v997_v17 }
 0x106   :  { %v846_v18 = vpop.f32.mrb[0].mxu0 }
 0x107   :  { %v847_v20 = vpop.f32.mrb[1].mxu0 }
 0x108   :  { %v848_v21 = vadd.f32 %v847_v20, %v846_v18  ;;  %v849_v22 = vpop.f32.mrb[2].mxu0  ;;  %v868_v23 = vpop.f32.mrb[0].mxu1 }
 0x109   :  { %v850_v24 = vpop.f32.mrb[3].mxu0  ;;  %v869_v25 = vpop.f32.mrb[1].mxu1 }
 0x10a   :  { %v524_v26 = vadd.f32 %v848_v21, %v770_v19  ;;  %v870_v27 = vadd.f32 %v869_v25, %v868_v23  ;;  %v871_v28 = vpop.f32.mrb[2].mxu1 }
 0x10b   :  { %v872_v29 = vpop.f32.mrb[3].mxu1 }
 0x10c   :  { %v564_v30 = vadd.f32 %v870_v27, %v524_v26 }
 0x110   :  { %v643_v31 = vpop.f32.mrb[4].mxu1 }
 0x111   :  { %v911_v32 = vpop.f32.mrb[5].mxu1 }
 0x112   :  { %v646_v33 = vpop.f32.mrb[6].mxu1 }
 0x113   :  { %v912_v34 = vpop.f32.mrb[7].mxu1 }
 0x126   :  { %v890_v35 = vpop.f32.mrb[4].mxu0 }
 0x127   :  { %v891_v36 = vpop.f32.mrb[5].mxu0 }
 0x128   :  { %v892_v37 = vadd.f32 %v891_v36, %v890_v35  ;;  %v893_v38 = vpop.f32.mrb[6].mxu0 }
 0x129   :  { %v894_v39 = vpop.f32.mrb[7].mxu0 }
 0x12a   :  { %v604_v40 = vadd.f32 %v892_v37, %v564_v30 }
 0x12c   :  { %v644_v41 = vadd.f32 %v643_v31, %v604_v40 }
 0x12e   :  { %v649_v42 = vmax.f32 %v644_v41, 0.0 }
 0x130   :  { %v650_v43 = vpack.c.bf16 %v649_v42, %v649_v42 }
 0x132   :  { %930 = vmatmul.mubr.bf16.vlgmr.msra.gmra.mrb[8].mxu1 %v650_v43 }
 0x205   :  { %v756_v45 = vpop.f32.mrb[8].mxu1 }
 0x206   :  { %v757_v46 = vadd.f32 %v821_v44, %v756_v45  ;;  %v931_v47 = vpop.f32.mrb[9].mxu1 }
 0x207   :  { %v759_v48 = vpop.f32.mrb[10].mxu1 }
 0x208   :  { %v762_v49 = vmax.f32 %v757_v46, 0.0  ;;  %v932_v50 = vpop.f32.mrb[11].mxu1 }
 0x20a   :  { %v763_v51 = vpack.c.bf16 %v762_v49, %v762_v49 }
 0x20c   :  { %764 = vst [vmem:[%s1128_s5] sm:$0x1] %v763_v51 }
 0x20d   :  { %769 = vsyncpa [#allocation3], 1 }

</bundles_post_ra>
